<compile_context>
chip_gen: v5e
topology: v5e:2x2
jax: 0.10.0
libtpu: 0.0.40
codegen_flags: <defaults>
</compile_context>

<pallas_src>
import functools

import jax
import jax.numpy as jnp
from jax.experimental import pallas as pl
from jax.experimental.pallas import tpu as pltpu

_LANE_WIDTH = 384  # lcm(3, 128): lane index % 3 == coordinate id, lane-dense


# ----------------------------------------------------------------------------
# Host-side octree glue (mirrors OctreeNode / Octree / VQAD._search)
# ----------------------------------------------------------------------------
class _Node:
    def __init__(self, x, y, z, size, data=None):
        self.x, self.y, self.z, self.size, self.data = x, y, z, size, data
        self.children = [None] * 8


def build_octree_leaf_centers():
    """Root at (0,0,0) size 1 with its 8 octant children carrying data."""
    root = _Node(0.0, 0.0, 0.0, 1.0)
    for idx in range(8):
        cx = root.x + (idx & 1) * root.size / 2
        cy = root.y + ((idx & 2) >> 1) * root.size / 2
        cz = root.z + ((idx & 4) >> 2) * root.size / 2
        root.children[idx] = _Node(cx, cy, cz, root.size / 2, data=idx)

    centers = []

    def _search(node):  # same traversal order as VQAD._search
        if node.data is not None:
            centers.append([node.x, node.y, node.z])
        else:
            for child in node.children:
                if child is not None:
                    _search(child)

    _search(root)
    return jnp.asarray(centers, dtype=jnp.float32)  # (K, 3)


# ----------------------------------------------------------------------------
# Tile sizing (per-generation VMEM aware)
# ----------------------------------------------------------------------------
def _pick_tile_rows(lane_width, r_total, max_tile_rows=None):
    try:
        info = pltpu.get_tpu_info()
        vmem_bytes = int(getattr(info, "vmem_capacity_bytes", 64 << 20))
    except Exception:  # CPU / interpret fallback
        vmem_bytes = 64 << 20
    # Double-buffered x stream budgeted at ~1/8 of physical VMEM, clamped to
    # [1 MiB, 6 MiB] per buffer -> fits every generation's scoped default.
    per_buf = max(1 << 20, min(vmem_bytes // 16, 6 << 20))
    rows = per_buf // (lane_width * 4)
    if max_tile_rows is not None:
        rows = min(rows, max_tile_rows)
    rows = max(8, (rows // 8) * 8)
    return r_total if r_total <= rows else rows


# ----------------------------------------------------------------------------
# Kernel 1: streaming per-column sum / sum-of-squares reduction over x
# ----------------------------------------------------------------------------
def _vqad_stream_kernel(x_ref, sq_ref, sum_ref, *,
                        steps_per_split, full_rows, rem_cols):
    s = pl.program_id(0)          # parallel split (megacore on v7x)
    k = pl.program_id(1)          # reduction step within the split

    @pl.when(k == 0)
    def _init():
        sq_ref[...] = jnp.zeros_like(sq_ref)
        sum_ref[...] = jnp.zeros_like(sum_ref)

    tr, cc = x_ref.shape
    # Nominal (unclamped) global row of every element of this tile.  The ragged
    # tail / duplicated clamped blocks are masked to zero: Pallas does not
    # guarantee zero-fill of OOB block contents.
    row0 = (s * steps_per_split + k) * tr
    rows = row0 + jax.lax.broadcasted_iota(jnp.int32, (tr, cc), 0)
    cols = jax.lax.broadcasted_iota(jnp.int32, (tr, cc), 1)
    valid = (rows < full_rows) | ((rows == full_rows) & (cols < rem_cols))

    x = jnp.where(valid, x_ref[...].astype(jnp.float32), 0.0)
    # Lane-vector partial accumulators (one f32 per lane) in sublane 0 of the
    # (8, C) output block; reduced once in the finalize kernel.
    sq_ref[0:1, :] += jnp.sum(x * x, axis=0, keepdims=True)
    sum_ref[0:1, :] += jnp.sum(x, axis=0, keepdims=True)


# ----------------------------------------------------------------------------
# Kernel 2: micro finalize - distances to the K leaves, argmax, 1-row gather
# ----------------------------------------------------------------------------
def _vqad_finalize_kernel(sq_ref, sum_ref, mask_ref, cT_ref, cb_hbm_ref,
                          out_ref, sem, *, n_points, k_nodes):
    s2 = jnp.sum(sq_ref[...])                                        # scalar
    sm = jnp.sum(sum_ref[...], axis=0, keepdims=True)                # (1, C)
    # Per-coordinate sums via lane%3 selection masks.
    xsum = jnp.sum(mask_ref[...] * sm, axis=1, keepdims=True)        # (3, 1)

    c = cT_ref[...].astype(jnp.float32)                              # (3, K)
    cross = jnp.sum(c * xsum, axis=0, keepdims=True)                 # (1, K)
    cnorm = jnp.sum(c * c, axis=0, keepdims=True)                    # (1, K)
    dist_sq = s2 - 2.0 * cross + jnp.float32(n_points) * cnorm       # (1, K)

    # argmax with first-index tie-break (sqrt/softmax are monotone, so this is
    # the same index as argmax(softmax(||x - c||))).
    ids = jax.lax.broadcasted_iota(jnp.int32, dist_sq.shape, 1)
    maxd = jnp.max(dist_sq)
    idx = jnp.min(jnp.where(dist_sq >= maxd, ids, jnp.int32(k_nodes)))

    # Single-row codebook gather: DMA the selected (1, D) row HBM -> out.
    cp = pltpu.make_async_copy(cb_hbm_ref.at[pl.ds(idx, 1), :], out_ref, sem)
    cp.start()
    cp.wait()


# ----------------------------------------------------------------------------
# Wrapper
# ----------------------------------------------------------------------------
def vqad_forward(x, node_centers, codebook, *, max_tile_rows=None):
    n, three = x.shape
    assert three == 3
    k_nodes, _ = node_centers.shape
    _, d = codebook.shape

    C = _LANE_WIDTH
    n_flat = 3 * n
    full_rows, rem_cols = divmod(n_flat, C)
    r_total = max(1, pl.cdiv(n_flat, C))

    # Flat contiguous view of the row-major (N, 3) point cloud: free bitcast
    # reshape.  Only a ragged tail (N % 128 != 0) needs a pad; in-kernel
    # masking handles the padded / OOB lanes either way.
    x_flat = x.reshape(-1)
    if n_flat != r_total * C:
        x_flat = jnp.pad(x_flat, (0, r_total * C - n_flat))
    x2d = x_flat.reshape(r_total, C)

    tile_r = _pick_tile_rows(C, r_total, max_tile_rows)
    n_blocks = pl.cdiv(r_total, tile_r)
    num_splits = 2 if n_blocks >= 2 else 1      # 2-TC split on v7x; harmless on 1-TC chips
    spp = pl.cdiv(n_blocks, num_splits)

    tile_bytes = tile_r * C * 4
    vmem_limit = min(2 * tile_bytes + (4 << 20), 100 << 20)

    stream = functools.partial(_vqad_stream_kernel, steps_per_split=spp,
                               full_rows=full_rows, rem_cols=rem_cols)

    sq_part, sum_part = pl.pallas_call(
        stream,
        out_shape=(jax.ShapeDtypeStruct((num_splits * 8, C), jnp.float32),
                   jax.ShapeDtypeStruct((num_splits * 8, C), jnp.float32)),
        grid_spec=pltpu.PrefetchScalarGridSpec(
            num_scalar_prefetch=0,
            grid=(num_splits, spp),
            in_specs=[pl.BlockSpec(
                (tile_r, C),
                # clamp: the last split may have fewer real blocks; duplicated
                # reads are fully masked in-kernel.
                lambda s, k: (jnp.minimum(s * spp + k, n_blocks - 1), 0))],
            out_specs=[pl.BlockSpec((8, C), lambda s, k: (s, 0)),
                       pl.BlockSpec((8, C), lambda s, k: (s, 0))],
        ),
        compiler_params=pltpu.CompilerParams(
            dimension_semantics=("parallel", "arbitrary"),
            vmem_limit_bytes=vmem_limit),
    )(x2d)

    # lane%3 coordinate-selection masks (tiny, built once on host).
    lane = jnp.arange(C, dtype=jnp.int32)
    coord_masks = (lane[None, :] % 3 ==
                   jnp.arange(3, dtype=jnp.int32)[:, None]).astype(jnp.float32)
    cT = jnp.transpose(node_centers).astype(jnp.float32)   # (3, K), tiny

    fin = functools.partial(_vqad_finalize_kernel,
                            n_points=float(n), k_nodes=k_nodes)
    out = pl.pallas_call(
        fin,
        out_shape=jax.ShapeDtypeStruct((1, d), codebook.dtype),
        grid_spec=pltpu.PrefetchScalarGridSpec(
            num_scalar_prefetch=0,
            grid=(1,),
            in_specs=[
                pl.BlockSpec((num_splits * 8, C), lambda i: (0, 0)),
                pl.BlockSpec((num_splits * 8, C), lambda i: (0, 0)),
                pl.BlockSpec((3, C), lambda i: (0, 0)),
                pl.BlockSpec((3, k_nodes), lambda i: (0, 0)),
                pl.BlockSpec(memory_space=pl.ANY),          # codebook in HBM
            ],
            out_specs=pl.BlockSpec((1, d), lambda i: (0, 0)),
            scratch_shapes=[pltpu.SemaphoreType.DMA(())],
        ),
        compiler_params=pltpu.CompilerParams(
            dimension_semantics=("arbitrary",)),
    )(sq_part, sum_part, coord_masks, cT, codebook)
    return out[0]  # (embedding_dim,)


# ----------------------------------------------------------------------------
# Pure-JAX reference (for a sanity check)
# ----------------------------------------------------------------------------
def vqad_reference(x, node_centers, codebook):
    diff = x[None, :, :] - node_centers[:, None, :]          # (K, N, 3)
    dist = jnp.sqrt(jnp.sum(diff * diff, axis=(1, 2)))       # (K,)
    probs = jax.nn.softmax(dist)
    idx = jnp.argmax(probs)
    return codebook[idx]


if __name__ == "__main__":
    embedding_dim = 32
    codebook_size = 16
    batch = 4

    key = jax.random.PRNGKey(0)
    kx, kc, kx2 = jax.random.split(key, 3)

    codebook = jax.random.normal(kc, (codebook_size, embedding_dim),
                                 dtype=jnp.float32)
    node_centers = build_octree_leaf_centers()  # (8, 3)

    # Small check (single tile, ragged-tail mask path).
    x = jax.random.uniform(kx, (batch, 3), dtype=jnp.float32,
                           minval=-1.0, maxval=1.0)
    out = jax.block_until_ready(vqad_forward(x, node_centers, codebook))
    ref = jax.block_until_ready(vqad_reference(x, node_centers, codebook))
    assert out.shape == (embedding_dim,)
    assert jnp.allclose(out, ref, atol=1e-5), "kernel mismatch vs reference"

    # Multi-tile check: exercises the reduction grid, the 2-way parallel split,
    # the clamped index_map and the partial boundary block.
    x_big = jax.random.uniform(kx2, (10000, 3), dtype=jnp.float32,
                               minval=-1.0, maxval=1.0)
    out2 = jax.block_until_ready(
        vqad_forward(x_big, node_centers, codebook, max_tile_rows=16))
    ref2 = jax.block_until_ready(
        vqad_reference(x_big, node_centers, codebook))
    assert jnp.allclose(out2, ref2, atol=1e-5), "kernel mismatch (multi-tile)"

    print("KERNEL_OK")
</pallas_src>

<mosaic_0001>
module attributes {stable_mosaic.version = 11 : i64} {
  func.func @_vqad_stream_kernel(%arg0: i32, %arg1: i32, %arg2: memref<1x384xf32, #tpu.memory_space<vmem>>, %arg3: memref<8x384xf32, #tpu.memory_space<vmem>>, %arg4: memref<8x384xf32, #tpu.memory_space<vmem>>) attributes {dimension_semantics = [#tpu.dimension_semantics<parallel>, #tpu.dimension_semantics<arbitrary>], iteration_bounds = array<i64: 1, 1>, scalar_prefetch = 0 : i64, scratch_operands = 0 : i64, tpu.core_type = #tpu.core_type<tc>, window_params = [{transform_indices = @transform_0, window_bounds = array<i64: 1, 384>}, {transform_indices = @transform_1, window_bounds = array<i64: 8, 384>}, {transform_indices = @transform_2, window_bounds = array<i64: 8, 384>}]} {
    %c0_i32 = arith.constant 0 : i32
    %0 = arith.cmpi eq, %arg1, %c0_i32 : i32
    %1 = arith.extui %0 : i1 to i32
    %c0_i32_0 = arith.constant 0 : i32
    %2 = arith.cmpi ne, %1, %c0_i32_0 : i32
    scf.if %2 {
      %cst_15 = arith.constant 0.000000e+00 : f32
      %32 = vector.broadcast %cst_15 : f32 to vector<8x384xf32>
      %c0_16 = arith.constant 0 : index
      %c0_17 = arith.constant 0 : index
      %33 = vector.load %arg3[%c0_16, %c0_17] : memref<8x384xf32, #tpu.memory_space<vmem>>, vector<8x384xf32>
      tpu.vector_store %arg3[%c0_16, %c0_17], %32 {strides = array<i32>} : memref<8x384xf32, #tpu.memory_space<vmem>>, vector<8x384xf32>,
      %cst_18 = arith.constant 0.000000e+00 : f32
      %34 = vector.broadcast %cst_18 : f32 to vector<8x384xf32>
      %c0_19 = arith.constant 0 : index
      %c0_20 = arith.constant 0 : index
      %35 = vector.load %arg4[%c0_19, %c0_20] : memref<8x384xf32, #tpu.memory_space<vmem>>, vector<8x384xf32>
      tpu.vector_store %arg4[%c0_19, %c0_20], %34 {strides = array<i32>} : memref<8x384xf32, #tpu.memory_space<vmem>>, vector<8x384xf32>,
    } else {
    }
    %c1_i32 = arith.constant 1 : i32
    %3 = arith.muli %arg0, %c1_i32 : i32
    %4 = arith.addi %3, %arg1 : i32
    %c1_i32_1 = arith.constant 1 : i32
    %5 = arith.muli %4, %c1_i32_1 : i32
    %6 = tpu.iota {dimensions = array<i32: 0>} : vector<1x384xi32>
    %7 = vector.broadcast %5 : i32 to vector<1x384xi32>
    %8 = arith.addi %7, %6 : vector<1x384xi32>
    %9 = tpu.iota {dimensions = array<i32: 1>} : vector<1x384xi32>
    %c0_i32_2 = arith.constant 0 : i32
    %10 = vector.broadcast %c0_i32_2 : i32 to vector<1x384xi32>
    %11 = arith.cmpi slt, %8, %10 : vector<1x384xi32>
    %c0_i32_3 = arith.constant 0 : i32
    %12 = vector.broadcast %c0_i32_3 : i32 to vector<1x384xi32>
    %13 = arith.cmpi eq, %8, %12 : vector<1x384xi32>
    %c12_i32 = arith.constant 12 : i32
    %14 = vector.broadcast %c12_i32 : i32 to vector<1x384xi32>
    %15 = arith.cmpi slt, %9, %14 : vector<1x384xi32>
    %16 = arith.andi %13, %15 : vector<1x384xi1>
    %17 = arith.ori %11, %16 : vector<1x384xi1>
    %c0 = arith.constant 0 : index
    %c0_4 = arith.constant 0 : index
    %18 = vector.load %arg2[%c0, %c0_4] : memref<1x384xf32, #tpu.memory_space<vmem>>, vector<1x384xf32>
    %cst = arith.constant 0.000000e+00 : f32
    %19 = vector.broadcast %cst : f32 to vector<1x384xf32>
    %20 = arith.select %17, %18, %19 : vector<1x384xi1>, vector<1x384xf32>
    %c0_5 = arith.constant 0 : index
    %c0_6 = arith.constant 0 : index
    %21 = vector.load %arg3[%c0_5, %c0_6] : memref<8x384xf32, #tpu.memory_space<vmem>>, vector<1x384xf32>
    %22 = arith.mulf %20, %20 : vector<1x384xf32>
    %cst_7 = arith.constant dense<0.000000e+00> : vector<384xf32>
    %23 = vector.multi_reduction <add>, %22, %cst_7 [0] : vector<1x384xf32> to vector<384xf32>
    %24 = vector.shape_cast %23 : vector<384xf32> to vector<1x384xf32>
    %25 = arith.addf %21, %24 : vector<1x384xf32>
    %c0_8 = arith.constant 0 : index
    %c0_9 = arith.constant 0 : index
    %26 = vector.load %arg3[%c0_8, %c0_9] : memref<8x384xf32, #tpu.memory_space<vmem>>, vector<1x384xf32>
    tpu.vector_store %arg3[%c0_8, %c0_9], %25 {strides = array<i32>} : memref<8x384xf32, #tpu.memory_space<vmem>>, vector<1x384xf32>,
    %c0_10 = arith.constant 0 : index
    %c0_11 = arith.constant 0 : index
    %27 = vector.load %arg4[%c0_10, %c0_11] : memref<8x384xf32, #tpu.memory_space<vmem>>, vector<1x384xf32>
    %cst_12 = arith.constant dense<0.000000e+00> : vector<384xf32>
    %28 = vector.multi_reduction <add>, %20, %cst_12 [0] : vector<1x384xf32> to vector<384xf32>
    %29 = vector.shape_cast %28 : vector<384xf32> to vector<1x384xf32>
    %30 = arith.addf %27, %29 : vector<1x384xf32>
    %c0_13 = arith.constant 0 : index
    %c0_14 = arith.constant 0 : index
    %31 = vector.load %arg4[%c0_13, %c0_14] : memref<8x384xf32, #tpu.memory_space<vmem>>, vector<1x384xf32>
    tpu.vector_store %arg4[%c0_13, %c0_14], %30 {strides = array<i32>} : memref<8x384xf32, #tpu.memory_space<vmem>>, vector<1x384xf32>,
    return
  }
  func.func @transform_0(%arg0: i32, %arg1: i32) -> (i32, i32) {
    %c1_i32 = arith.constant 1 : i32
    %0 = arith.muli %arg0, %c1_i32 : i32
    %1 = arith.addi %0, %arg1 : i32
    %c0_i32 = arith.constant 0 : i32
    %2 = arith.minsi %1, %c0_i32 : i32
    %c0_i32_0 = arith.constant 0 : i32
    %c0_i32_1 = arith.constant 0 : i32
    return %2, %c0_i32_0 : i32, i32
  }
  func.func @transform_1(%arg0: i32, %arg1: i32) -> (i32, i32) {
    %c0_i32 = arith.constant 0 : i32
    %c0_i32_0 = arith.constant 0 : i32
    return %arg0, %c0_i32 : i32, i32
  }
  func.func @transform_2(%arg0: i32, %arg1: i32) -> (i32, i32) {
    %c0_i32 = arith.constant 0 : i32
    %c0_i32_0 = arith.constant 0 : i32
    return %arg0, %c0_i32 : i32, i32
  }
}

</mosaic_0001>

<bundles_post_ra>
// kernel: tpu_custom_call.1
= control target key start
LH: loop header
LB: loop body
LE: loop exit
PB: predicated region body
PF: predicated region fallthrough
CT: control target
= control target key end

     0   :  { %8 = vsyncpa [#allocation3], 0  ;;  %s259_s0 = inlined_call_operand.hbm [shape: f32[1,384], index: 0, kind: input, shape index: {}]   ;;  %s260_s1 = inlined_call_operand.hbm [shape: f32[8,384], index: 1, kind: output, shape index: {0}]   ;;  %s261_s2 = inlined_call_operand.hbm [shape: f32[8,384], index: 2, kind: output, shape index: {1}]  }
   0x1   :  { %9 = vsyncpa [#allocation4], 0 }
   0x2   :  { %10 = vsyncpa [#allocation7], 0  ;;  %s21_s11 = sshll.u32 %s259_s0, 4  ;;  %s231_s12 = smov [#allocation2]   ;;  %s22_s11 = int_to_ptr.hbm [resolvable:$true] %s21_s11 }
   0x3   :  { %s23_s13 = sshll.u32 %s231_s12, 4  ;;  %s24_s13 = int_to_ptr.vmem [resolvable:$true] %s23_s13 }
   0x4   :  { %26 = dma.hbm_to_vmem [thread:$0]  %s22_s11, 48, %s24_s13, [#allocation3]  }
   0x5   :  { %225 = dma.done.wait [#allocation3], 48  }
   0x6   :  { %226 = vsyncadd [#allocation3], 4294967248  ;;  %v45_v0 = vlaneseq  ;;  %v232_v1 = vmov 0.0   ;;  %v64_v4 = vld [vmem:[#allocation2] sm:$0x7]  ;;  %vm87_vm3 = vcmask 1040384  }
   0x7   :  { %38 = vst [vmem:[#allocation5] sm:$0xff] %v232_v1  ;;  %v85_v5 = vrot.slane %v232_v1, 7  ;;  %v66_v6 = vperm.slane %v64_v4, 0  ;;  %v86_v7 = vrot.slane %v232_v1, 6  ;;  %vm89_vm4 = vcmask 1041408   ;;  %s233_s0 = smov [#allocation6]  }
   0x8   :  { %39 = vst [vmem:[#allocation5 + $0x8] sm:$0xff] %v232_v1  ;;  %v46_v2 = vshrl.u32 %v45_v0, 7  ;;  %v50_v3 = vand.u32 127, %v45_v0  ;;  %s130_s14 = sshll.u32 %s233_s0, 4  ;;  %s132_s17 = sshll.u32 %s261_s2, 4  ;;  %vm95_vm5 = vcmp.lt.s32.totalorder %v45_v0, 384  ;;  %s131_s14 = int_to_ptr.vmem [resolvable:$true] %s130_s14  ;;  %s133_s17 = int_to_ptr.hbm [resolvable:$true] %s132_s17 }
   0x9   :  { %40 = vst [vmem:[#allocation5 + $0x10] sm:$0xff] %v232_v1  ;;  %s234_s18 = smov [#allocation5]   ;;  %s121_s22 = sshll.u32 %s260_s1, 4  ;;  %s122_s22 = int_to_ptr.hbm [resolvable:$true] %s121_s22 }
   0xa   :  { %41 = vst [vmem:[#allocation6] sm:$0xff] %v232_v1  ;;  %vm54_vm0 = vcmp.eq.s32.totalorder %v46_v2, 0  ;;  %vm55_vm1 = vcmp.lt.s32.totalorder %v50_v3, 12  ;;  %s119_s19 = sshll.u32 %s234_s18, 4  ;;  %s120_s19 = int_to_ptr.vmem [resolvable:$true] %s119_s19 }
   0xb   :  { %42 = vst [vmem:[#allocation6 + $0x8] sm:$0xff] %v232_v1  ;;  %vm58_vm2 = vmand %vm54_vm0, %vm55_vm1 }
   0xc   :  { %43 = vst [vmem:[#allocation6 + $0x10] sm:$0xff] %v232_v1  ;;  %v72_v8 = vsel %vm58_vm2, %v66_v6, 0.0 }
   0xd   :  { %v76_v9 = vmul.f32 %v72_v8, %v72_v8  ;;  %v108_v10 = vsel %vm87_vm3, %v72_v8, %v85_v5 }
   0xe   :  { %v109_v12 = vsel %vm89_vm4, %v108_v10, %v86_v7 }
   0xf   :  { %v88_v13 = vsel %vm87_vm3, %v76_v9, %v85_v5 }
  0x10   :  { %v75_v11 = vld [vmem:[#allocation5] ss:$8 sm:$0x7]  ;;  %v90_v15 = vsel %vm89_vm4, %v88_v13, %v86_v7 }
  0x11   :  { %v92_v17 = vadd.f32 %v90_v15, %v75_v11 }
  0x13   :  { %v99_v14 = vld [vmem:[#allocation6] ss:$8 sm:$0x7]  ;;  %97 = vst.msk [vmem:[#allocation5] ss:$8 sm:$0x7] %vm95_vm5, %v92_v17 }
  0x14   :  { %v111_v16 = vadd.f32 %v109_v12, %v99_v14  ;;  %124 = dma.vmem_to_hbm [thread:$0]  %s120_s19, 384, %s122_s22, [#allocation4]  }
  0x16   :  { %112 = vst.msk [vmem:[#allocation6] ss:$8 sm:$0x7] %vm95_vm5, %v111_v16 }
  0x17   :  { %135 = dma.vmem_to_hbm [thread:$0]  %s131_s14, 384, %s133_s17, [#allocation7]  }
  0x18   :  { %227 = dma.done.wait [#allocation4], 384  }
  0x19   :  { %228 = vsyncadd [#allocation4], 4294966912 }
  0x1a   :  { %229 = dma.done.wait [#allocation7], 384  }
  0x1b   :  { %230 = vsyncadd [#allocation7], 4294966912 }
  0x1c   :  { %144 = vsyncpa [#allocation3], 1 }
  0x1d   :  { %145 = vsyncpa [#allocation4], 1 }
  0x1e   :  { %146 = vsyncpa [#allocation7], 1 }

</bundles_post_ra>
